<compile_context>
chip_gen: v7x
topology: tpu7x:2x2x1
jax: 0.10.0
libtpu: 0.0.40
codegen_flags: <defaults>
</compile_context>

<pallas_src>
import functools

import jax
import jax.numpy as jnp
from jax.experimental import pallas as pl
from jax.experimental.pallas import tpu as pltpu


def _silu(x):
    return x * jax.nn.sigmoid(x)


# ----------------------------------------------------------------------------
# Kernel: one batch sample per grid step, everything in a lane-dense 2D view.
# ----------------------------------------------------------------------------
def resblock_kernel(x_ref, emb_ref, w1_ref, w2_ref, embw_ref, p_ref, out_ref,
                    *, n_groups, channels, eps=1e-5):
    H, WC = x_ref.shape                      # [H, W*C]
    w_spatial = WC // channels
    cg = channels // n_groups
    inv_n = 1.0 / float(H * w_spatial * cg)  # elements per group per sample

    x = x_ref[...]                           # [H, W*C] (one sample, lane-dense)
    P = p_ref[...]                           # [8+G, W*C] packed per-column params
    colMT = P[8:8 + n_groups, :]             # [G, W*C] one-hot column -> group

    def group_norm(v, gamma, beta):
        # Two-pass: mean first, then centered variance (avoids E[x^2]-E[x]^2
        # cancellation).  Group reduce / broadcast via tiny matmuls with colMT.
        s = jnp.sum(v, axis=0, keepdims=True)                                  # [1, WC]
        gsum = jax.lax.dot_general(s, colMT, (((1,), (1,)), ((), ())),
                                   preferred_element_type=jnp.float32)         # [1, G]
        gmean = gsum * inv_n
        mean_c = jnp.dot(gmean, colMT, preferred_element_type=jnp.float32)     # [1, WC]
        d = v - mean_c
        ssq = jnp.sum(d * d, axis=0, keepdims=True)                            # [1, WC]
        gvar = jax.lax.dot_general(ssq, colMT, (((1,), (1,)), ((), ())),
                                   preferred_element_type=jnp.float32) * inv_n
        inv_c = jnp.dot(jax.lax.rsqrt(gvar + eps), colMT,
                        preferred_element_type=jnp.float32)                    # [1, WC]
        return d * inv_c * gamma[None, :] + beta[None, :]

    def conv3x3(v, w_packed_ref, bias):
        # The kx taps live inside the block-banded weight, so the whole conv is
        # a single matmul [H, 3*W*Cin] @ [3*W*Cin, W*Cout].  Only the ky row
        # shifts are built here via a zero-padded concat (no padded scratch).
        zrow = jnp.zeros((1, v.shape[1]), jnp.float32)
        vp = jnp.concatenate([zrow, v, zrow], axis=0)          # [H+2, W*Cin]
        patches = jnp.concatenate([vp[:H, :], v, vp[2:, :]], axis=1)  # [H, 3*W*Cin]
        o = jnp.dot(patches, w_packed_ref[...], preferred_element_type=jnp.float32)
        return o + bias[None, :]

    # ---- in_layers: GroupNorm -> SiLU -> conv3x3 ----
    h = conv3x3(_silu(group_norm(x, P[0], P[1])), w1_ref, P[2])
    WCo = h.shape[1]

    # ---- emb_layers: SiLU -> Linear (one matmul; scale/shift pre-tiled over W) ----
    e = _silu(emb_ref[...])                                                    # [1, E]
    ss = jnp.dot(e, embw_ref[...], preferred_element_type=jnp.float32)         # [1, 2*WCo]
    scale = ss[:, :WCo] + P[6][None, :]
    shift = ss[:, WCo:] + P[7][None, :]

    # ---- out_layers: GN -> *(1+scale)+shift -> SiLU -> Dropout(eval) -> conv ----
    h = _silu(group_norm(h, P[3], P[4]) * (1.0 + scale) + shift)
    # TODO(synk): nn.Dropout(p=0.5) is identity in eval mode; training-mode RNG dropout not implemented.
    h = conv3x3(h, w2_ref, P[5])

    # ---- residual (skip_connection = Identity since Cin == Cout) ----
    out_ref[...] = h + x


# ----------------------------------------------------------------------------
# Wrapper glue: layout conversion + parameter packing (plain JAX, outside kernel)
# ----------------------------------------------------------------------------
def _pack_conv_weight(w_oihw, w_spatial, padding):
    """OIHW 3x3 weight -> block-banded [kh*W*Cin, W*Cout] im2col-style matrix.

    row index:  ky*(W*Cin) + w_in*Cin + ci      (matches patches layout)
    col index:  w_out*Cout + co                 (matches lane-dense output)
    entry: weight[co, ci, ky, kx] with kx = w_in - w_out + padding (0 if OOB).
    """
    cout, cin, kh, kw = w_oihw.shape
    wt = jnp.transpose(w_oihw, (2, 3, 1, 0))                    # [kh, kw, Cin, Cout]
    w_in = jnp.arange(w_spatial)[:, None]
    w_out = jnp.arange(w_spatial)[None, :]
    kx = w_in - w_out + padding                                 # [W, W]
    valid = (kx >= 0) & (kx < kw)
    wt_g = wt[:, jnp.clip(kx, 0, kw - 1)]                       # [kh, W, W, Cin, Cout]
    wt_g = jnp.where(valid[None, :, :, None, None], wt_g, 0.0)
    wt_g = jnp.transpose(wt_g, (0, 1, 3, 2, 4))                 # [kh, Win, Cin, Wout, Cout]
    return wt_g.reshape(kh * w_spatial * cin, w_spatial * cout).astype(jnp.float32)


def resblock_forward(x_nchw, emb, params, *, n_groups):
    B, C, H, W = x_nchw.shape
    Cout, Cin, kh, kw = params["conv1_w"].shape
    assert Cout == C and Cin == C, "example uses identity skip (n_out_channels == n_channels)"
    assert kh == 3 and kw == 3
    pad = 1
    E = emb.shape[1]
    G = n_groups
    WC = W * C

    # NOTE: accepting NHWC at the API boundary would remove this transpose pair;
    # kept here to preserve the PyTorch NCHW interface.
    x3 = jnp.transpose(x_nchw, (0, 2, 3, 1)).reshape(B, H, WC).astype(jnp.float32)
    emb3 = emb.reshape(B, 1, E).astype(jnp.float32)

    w1 = _pack_conv_weight(params["conv1_w"], W, pad)           # [3*W*C, W*Cout]
    w2 = _pack_conv_weight(params["conv2_w"], W, pad)

    # PyTorch Linear weight is (2*Cout, E); chunk(dim=1) -> first half = scale.
    # Pre-tile columns over W so the kernel gets scale/shift already per-column.
    ws = jnp.tile(params["emb_w"][:Cout].T, (1, W))             # [E, W*Cout]
    wh = jnp.tile(params["emb_w"][Cout:].T, (1, W))             # [E, W*Cout]
    embw = jnp.concatenate([ws, wh], axis=1).astype(jnp.float32)  # [E, 2*W*Cout]

    def trow(v):                                                # per-channel -> per-column
        return jnp.tile(v.reshape(-1), W)

    cg = C // G
    col_grp = jnp.tile(jnp.arange(C) // cg, W)                  # channel-group of each column
    colMT = (col_grp[None, :] == jnp.arange(G)[:, None]).astype(jnp.float32)   # [G, W*C]

    pstack = jnp.concatenate([
        jnp.stack([trow(params["gn1_w"]), trow(params["gn1_b"]), trow(params["conv1_b"]),
                   trow(params["gn2_w"]), trow(params["gn2_b"]), trow(params["conv2_b"]),
                   trow(params["emb_b"][:Cout]), trow(params["emb_b"][Cout:])], axis=0),
        colMT], axis=0).astype(jnp.float32)                     # [8 + G, W*C]

    kernel = functools.partial(resblock_kernel, n_groups=G, channels=C)

    cost = pl.CostEstimate(
        flops=int(2 * B * H * (3 * WC) * WC * 2        # two fused conv matmuls
                  + 2 * B * E * 2 * WC                  # emb projection
                  + 16 * B * WC * G),                   # group-norm reduce/broadcast
        transcendentals=int(B * (2 * H * WC + E + 4 * G)),
        bytes_accessed=int(x3.nbytes + emb3.nbytes + w1.nbytes + w2.nbytes
                           + embw.nbytes + pstack.nbytes + x3.nbytes),
    )

    out3 = pl.pallas_call(
        kernel,
        out_shape=jax.ShapeDtypeStruct((B, H, WC), jnp.float32),
        grid=(B,),
        in_specs=[
            pl.BlockSpec((None, H, WC), lambda b: (b, 0, 0)),    # x, one sample/step
            pl.BlockSpec((None, 1, E), lambda b: (b, 0, 0)),     # emb, one sample/step
            pl.BlockSpec((3 * WC, WC), lambda b: (0, 0)),        # packed conv1 weight
            pl.BlockSpec((3 * WC, WC), lambda b: (0, 0)),        # packed conv2 weight
            pl.BlockSpec((E, 2 * WC), lambda b: (0, 0)),         # packed emb weight
            pl.BlockSpec((8 + G, WC), lambda b: (0, 0)),         # packed per-column params
        ],
        out_specs=pl.BlockSpec((None, H, WC), lambda b: (b, 0, 0)),
        compiler_params=pltpu.CompilerParams(dimension_semantics=("parallel",)),
        cost_estimate=cost,
    )(x3, emb3, w1, w2, embw, pstack)

    return jnp.transpose(out3.reshape(B, H, W, Cout), (0, 3, 1, 2))   # NHWC -> NCHW


# ----------------------------------------------------------------------------
# Pure-JAX reference (mirrors the PyTorch module in eval mode) for validation.
# ----------------------------------------------------------------------------
def _ref_forward(x, emb, params, n_groups, eps=1e-5):
    def gn(v, w, b):
        B, C, H, W = v.shape
        g = v.reshape(B, n_groups, C // n_groups, H, W)
        m = g.mean(axis=(2, 3, 4), keepdims=True)
        var = ((g - m) ** 2).mean(axis=(2, 3, 4), keepdims=True)
        out = ((g - m) / jnp.sqrt(var + eps)).reshape(B, C, H, W)
        return out * w[None, :, None, None] + b[None, :, None, None]

    def conv(v, w, b):
        o = jax.lax.conv_general_dilated(v, w, window_strides=(1, 1),
                                         padding=((1, 1), (1, 1)),
                                         dimension_numbers=("NCHW", "OIHW", "NCHW"))
        return o + b[None, :, None, None]

    silu = lambda t: t * jax.nn.sigmoid(t)
    h = conv(silu(gn(x, params["gn1_w"], params["gn1_b"])),
             params["conv1_w"], params["conv1_b"])
    eo = silu(emb) @ params["emb_w"].T + params["emb_b"]
    C = x.shape[1]
    scale, shift = eo[:, :C], eo[:, C:]
    h = gn(h, params["gn2_w"], params["gn2_b"]) * (1.0 + scale[:, :, None, None]) \
        + shift[:, :, None, None]
    h = conv(silu(h), params["conv2_w"], params["conv2_b"])
    return h + x


if __name__ == "__main__":
    key = jax.random.PRNGKey(0)
    B, C, H, W = 2, 8, 16, 16      # x: [B, C, H, W] (PyTorch NCHW convention)
    E = 16                          # n_emb_channels
    G = 4                           # n_groups

    ks = jax.random.split(key, 8)
    x = jax.random.normal(ks[0], (B, C, H, W), jnp.float32)
    emb = jax.random.normal(ks[1], (B, E), jnp.float32)

    params = {
        # in_layers
        "gn1_w": 1.0 + 0.05 * jax.random.normal(ks[6], (C,), jnp.float32),
        "gn1_b": 0.05 * jax.random.normal(ks[7], (C,), jnp.float32),
        "conv1_w": 0.1 * jax.random.normal(ks[2], (C, C, 3, 3), jnp.float32),   # OIHW
        "conv1_b": 0.1 * jax.random.normal(ks[3], (C,), jnp.float32),
        # emb_layers (Linear: weight (2*Cout, E), bias (2*Cout,))
        "emb_w": 0.1 * jax.random.normal(ks[4], (2 * C, E), jnp.float32),
        "emb_b": 0.1 * jax.random.normal(ks[5], (2 * C,), jnp.float32),
        # out_layers (zero_module initializes conv2 to zero; non-zero values
        # used here so the test exercises the full out_layers path)
        "gn2_w": jnp.ones((C,), jnp.float32),
        "gn2_b": jnp.zeros((C,), jnp.float32),
        "conv2_w": 0.05 * jax.random.normal(key, (C, C, 3, 3), jnp.float32),
        "conv2_b": jnp.zeros((C,), jnp.float32),
    }

    out = resblock_forward(x, emb, params, n_groups=G)
    out = jax.block_until_ready(out)
    assert out.shape == (B, C, H, W) and out.dtype == jnp.float32

    ref = jax.block_until_ready(_ref_forward(x, emb, params, G))
    err = float(jnp.max(jnp.abs(out - ref)))
    assert err < 2e-4, f"mismatch vs reference: max abs err = {err}"
    print("KERNEL_OK")
</pallas_src>

<mosaic_0001>
module attributes {stable_mosaic.version = 11 : i64} {
  func.func @resblock_kernel(%arg0: i32, %arg1: memref<1x16x128xf32, #tpu.memory_space<vmem>>, %arg2: memref<1x1x16xf32, #tpu.memory_space<vmem>>, %arg3: memref<384x128xf32, #tpu.memory_space<vmem>>, %arg4: memref<384x128xf32, #tpu.memory_space<vmem>>, %arg5: memref<16x256xf32, #tpu.memory_space<vmem>>, %arg6: memref<12x128xf32, #tpu.memory_space<vmem>>, %arg7: memref<1x16x128xf32, #tpu.memory_space<vmem>>) attributes {dimension_semantics = [#tpu.dimension_semantics<parallel>], iteration_bounds = array<i64: 2>, scalar_prefetch = 0 : i64, scratch_operands = 0 : i64, tpu.core_type = #tpu.core_type<tc>, window_params = [{transform_indices = @transform_0, window_bounds = array<i64: 1, 16, 128>}, {transform_indices = @transform_1, window_bounds = array<i64: 1, 1, 16>}, {pipeline_mode = #tpu.pipeline_mode<synchronous>, transform_indices = @transform_2, window_bounds = array<i64: 384, 128>}, {pipeline_mode = #tpu.pipeline_mode<synchronous>, transform_indices = @transform_3, window_bounds = array<i64: 384, 128>}, {pipeline_mode = #tpu.pipeline_mode<synchronous>, transform_indices = @transform_4, window_bounds = array<i64: 16, 256>}, {pipeline_mode = #tpu.pipeline_mode<synchronous>, transform_indices = @transform_5, window_bounds = array<i64: 12, 128>}, {transform_indices = @transform_6, window_bounds = array<i64: 1, 16, 128>}]} {
    %c0 = arith.constant 0 : index
    %c0_0 = arith.constant 0 : index
    %c0_1 = arith.constant 0 : index
    %0 = vector.load %arg1[%c0, %c0_0, %c0_1] : memref<1x16x128xf32, #tpu.memory_space<vmem>>, vector<1x16x128xf32>
    %1 = vector.shape_cast %0 : vector<1x16x128xf32> to vector<16x128xf32>
    %c0_2 = arith.constant 0 : index
    %c0_3 = arith.constant 0 : index
    %2 = vector.load %arg6[%c0_2, %c0_3] : memref<12x128xf32, #tpu.memory_space<vmem>>, vector<12x128xf32>
    %3 = vector.extract_strided_slice %2 {offsets = [8, 0], sizes = [4, 128], strides = [1, 1]} : vector<12x128xf32> to vector<4x128xf32>
    %4 = vector.extract_strided_slice %2 {offsets = [0, 0], sizes = [1, 128], strides = [1, 1]} : vector<12x128xf32> to vector<1x128xf32>
    %5 = vector.shape_cast %4 : vector<1x128xf32> to vector<128xf32>
    %6 = vector.extract_strided_slice %2 {offsets = [1, 0], sizes = [1, 128], strides = [1, 1]} : vector<12x128xf32> to vector<1x128xf32>
    %7 = vector.shape_cast %6 : vector<1x128xf32> to vector<128xf32>
    %cst = arith.constant dense<0.000000e+00> : vector<128xf32>
    %8 = vector.multi_reduction <add>, %1, %cst [0] : vector<16x128xf32> to vector<128xf32>
    %9 = vector.shape_cast %8 : vector<128xf32> to vector<1x128xf32>
    %cst_4 = arith.constant dense<0.000000e+00> : vector<1x4xf32>
    %10 = tpu.matmul %9, %3, %cst_4 {dimension_numbers = #tpu.dot_dimension_numbers<[1], [1], [0], [0], [0, 0, 1, 0], [], []>} : vector<1x128xf32>, vector<4x128xf32>, vector<1x4xf32> -> vector<1x4xf32>
    %cst_5 = arith.constant 0.001953125 : f32
    %11 = vector.broadcast %cst_5 : f32 to vector<1x4xf32>
    %12 = arith.mulf %10, %11 : vector<1x4xf32>
    %cst_6 = arith.constant dense<0.000000e+00> : vector<1x128xf32>
    %13 = tpu.matmul %12, %3, %cst_6 {dimension_numbers = #tpu.dot_dimension_numbers<[1], [0], [0], [1], [0, 0, 1, 1], [], []>} : vector<1x4xf32>, vector<4x128xf32>, vector<1x128xf32> -> vector<1x128xf32>
    %14 = vector.broadcast %13 : vector<1x128xf32> to vector<16x128xf32>
    %15 = arith.subf %1, %14 : vector<16x128xf32>
    %16 = arith.mulf %15, %15 : vector<16x128xf32>
    %cst_7 = arith.constant dense<0.000000e+00> : vector<128xf32>
    %17 = vector.multi_reduction <add>, %16, %cst_7 [0] : vector<16x128xf32> to vector<128xf32>
    %18 = vector.shape_cast %17 : vector<128xf32> to vector<1x128xf32>
    %cst_8 = arith.constant dense<0.000000e+00> : vector<1x4xf32>
    %19 = tpu.matmul %18, %3, %cst_8 {dimension_numbers = #tpu.dot_dimension_numbers<[1], [1], [0], [0], [0, 0, 1, 0], [], []>} : vector<1x128xf32>, vector<4x128xf32>, vector<1x4xf32> -> vector<1x4xf32>
    %cst_9 = arith.constant 0.001953125 : f32
    %20 = vector.broadcast %cst_9 : f32 to vector<1x4xf32>
    %21 = arith.mulf %19, %20 : vector<1x4xf32>
    %cst_10 = arith.constant 9.99999974E-6 : f32
    %22 = vector.broadcast %cst_10 : f32 to vector<1x4xf32>
    %23 = arith.addf %21, %22 : vector<1x4xf32>
    %24 = math.rsqrt %23 : vector<1x4xf32>
    %cst_11 = arith.constant dense<0.000000e+00> : vector<1x128xf32>
    %25 = tpu.matmul %24, %3, %cst_11 {dimension_numbers = #tpu.dot_dimension_numbers<[1], [0], [0], [1], [0, 0, 1, 1], [], []>} : vector<1x4xf32>, vector<4x128xf32>, vector<1x128xf32> -> vector<1x128xf32>
    %26 = vector.broadcast %25 : vector<1x128xf32> to vector<16x128xf32>
    %27 = arith.mulf %15, %26 : vector<16x128xf32>
    %28 = vector.shape_cast %5 : vector<128xf32> to vector<1x128xf32>
    %29 = vector.broadcast %28 : vector<1x128xf32> to vector<16x128xf32>
    %30 = arith.mulf %27, %29 : vector<16x128xf32>
    %31 = vector.shape_cast %7 : vector<128xf32> to vector<1x128xf32>
    %32 = vector.broadcast %31 : vector<1x128xf32> to vector<16x128xf32>
    %33 = arith.addf %30, %32 : vector<16x128xf32>
    %34 = arith.negf %33 : vector<16x128xf32>
    %35 = math.exp %34 : vector<16x128xf32>
    %cst_12 = arith.constant 1.000000e+00 : f32
    %36 = vector.broadcast %cst_12 : f32 to vector<16x128xf32>
    %37 = arith.addf %36, %35 : vector<16x128xf32>
    %38 = arith.divf %36, %37 : vector<16x128xf32>
    %39 = arith.mulf %33, %38 : vector<16x128xf32>
    %40 = vector.extract_strided_slice %2 {offsets = [2, 0], sizes = [1, 128], strides = [1, 1]} : vector<12x128xf32> to vector<1x128xf32>
    %41 = vector.shape_cast %40 : vector<1x128xf32> to vector<128xf32>
    %cst_13 = arith.constant 0.000000e+00 : f32
    %42 = vector.broadcast %cst_13 : f32 to vector<1x128xf32>
    %43 = tpu.concatenate %42, %39, %42 in 0 : vector<1x128xf32>, vector<16x128xf32>, vector<1x128xf32> -> vector<18x128xf32>
    %44 = vector.extract_strided_slice %43 {offsets = [0, 0], sizes = [16, 128], strides = [1, 1]} : vector<18x128xf32> to vector<16x128xf32>
    %45 = vector.extract_strided_slice %43 {offsets = [2, 0], sizes = [16, 128], strides = [1, 1]} : vector<18x128xf32> to vector<16x128xf32>
    %46 = tpu.concatenate %44, %39, %45 in 1 : vector<16x128xf32>, vector<16x128xf32>, vector<16x128xf32> -> vector<16x384xf32>
    %c0_14 = arith.constant 0 : index
    %c0_15 = arith.constant 0 : index
    %47 = vector.load %arg3[%c0_14, %c0_15] : memref<384x128xf32, #tpu.memory_space<vmem>>, vector<384x128xf32>
    %cst_16 = arith.constant dense<0.000000e+00> : vector<16x128xf32>
    %48 = tpu.matmul %46, %47, %cst_16 {dimension_numbers = #tpu.dot_dimension_numbers<[1], [0], [0], [1], [0, 0, 1, 1], [], []>} : vector<16x384xf32>, vector<384x128xf32>, vector<16x128xf32> -> vector<16x128xf32>
    %49 = vector.shape_cast %41 : vector<128xf32> to vector<1x128xf32>
    %50 = vector.broadcast %49 : vector<1x128xf32> to vector<16x128xf32>
    %51 = arith.addf %48, %50 : vector<16x128xf32>
    %c0_17 = arith.constant 0 : index
    %c0_18 = arith.constant 0 : index
    %c0_19 = arith.constant 0 : index
    %52 = vector.load %arg2[%c0_17, %c0_18, %c0_19] : memref<1x1x16xf32, #tpu.memory_space<vmem>>, vector<1x1x16xf32>
    %53 = vector.shape_cast %52 : vector<1x1x16xf32> to vector<1x16xf32>
    %54 = arith.negf %53 : vector<1x16xf32>
    %55 = math.exp %54 : vector<1x16xf32>
    %cst_20 = arith.constant 1.000000e+00 : f32
    %56 = vector.broadcast %cst_20 : f32 to vector<1x16xf32>
    %57 = arith.addf %56, %55 : vector<1x16xf32>
    %58 = arith.divf %56, %57 : vector<1x16xf32>
    %59 = arith.mulf %53, %58 : vector<1x16xf32>
    %c0_21 = arith.constant 0 : index
    %c0_22 = arith.constant 0 : index
    %60 = vector.load %arg5[%c0_21, %c0_22] : memref<16x256xf32, #tpu.memory_space<vmem>>, vector<16x256xf32>
    %cst_23 = arith.constant dense<0.000000e+00> : vector<1x256xf32>
    %61 = tpu.matmul %59, %60, %cst_23 {dimension_numbers = #tpu.dot_dimension_numbers<[1], [0], [0], [1], [0, 0, 1, 1], [], []>} : vector<1x16xf32>, vector<16x256xf32>, vector<1x256xf32> -> vector<1x256xf32>
    %62 = vector.extract_strided_slice %61 {offsets = [0, 0], sizes = [1, 128], strides = [1, 1]} : vector<1x256xf32> to vector<1x128xf32>
    %63 = vector.extract_strided_slice %2 {offsets = [6, 0], sizes = [1, 128], strides = [1, 1]} : vector<12x128xf32> to vector<1x128xf32>
    %64 = vector.shape_cast %63 : vector<1x128xf32> to vector<128xf32>
    %65 = vector.shape_cast %64 : vector<128xf32> to vector<1x128xf32>
    %66 = arith.addf %62, %65 : vector<1x128xf32>
    %67 = vector.extract_strided_slice %61 {offsets = [0, 128], sizes = [1, 128], strides = [1, 1]} : vector<1x256xf32> to vector<1x128xf32>
    %68 = vector.extract_strided_slice %2 {offsets = [7, 0], sizes = [1, 128], strides = [1, 1]} : vector<12x128xf32> to vector<1x128xf32>
    %69 = vector.shape_cast %68 : vector<1x128xf32> to vector<128xf32>
    %70 = vector.shape_cast %69 : vector<128xf32> to vector<1x128xf32>
    %71 = arith.addf %67, %70 : vector<1x128xf32>
    %72 = vector.extract_strided_slice %2 {offsets = [3, 0], sizes = [1, 128], strides = [1, 1]} : vector<12x128xf32> to vector<1x128xf32>
    %73 = vector.shape_cast %72 : vector<1x128xf32> to vector<128xf32>
    %74 = vector.extract_strided_slice %2 {offsets = [4, 0], sizes = [1, 128], strides = [1, 1]} : vector<12x128xf32> to vector<1x128xf32>
    %75 = vector.shape_cast %74 : vector<1x128xf32> to vector<128xf32>
    %cst_24 = arith.constant dense<0.000000e+00> : vector<128xf32>
    %76 = vector.multi_reduction <add>, %51, %cst_24 [0] : vector<16x128xf32> to vector<128xf32>
    %77 = vector.shape_cast %76 : vector<128xf32> to vector<1x128xf32>
    %cst_25 = arith.constant dense<0.000000e+00> : vector<1x4xf32>
    %78 = tpu.matmul %77, %3, %cst_25 {dimension_numbers = #tpu.dot_dimension_numbers<[1], [1], [0], [0], [0, 0, 1, 0], [], []>} : vector<1x128xf32>, vector<4x128xf32>, vector<1x4xf32> -> vector<1x4xf32>
    %cst_26 = arith.constant 0.001953125 : f32
    %79 = vector.broadcast %cst_26 : f32 to vector<1x4xf32>
    %80 = arith.mulf %78, %79 : vector<1x4xf32>
    %cst_27 = arith.constant dense<0.000000e+00> : vector<1x128xf32>
    %81 = tpu.matmul %80, %3, %cst_27 {dimension_numbers = #tpu.dot_dimension_numbers<[1], [0], [0], [1], [0, 0, 1, 1], [], []>} : vector<1x4xf32>, vector<4x128xf32>, vector<1x128xf32> -> vector<1x128xf32>
    %82 = vector.broadcast %81 : vector<1x128xf32> to vector<16x128xf32>
    %83 = arith.subf %51, %82 : vector<16x128xf32>
    %84 = arith.mulf %83, %83 : vector<16x128xf32>
    %cst_28 = arith.constant dense<0.000000e+00> : vector<128xf32>
    %85 = vector.multi_reduction <add>, %84, %cst_28 [0] : vector<16x128xf32> to vector<128xf32>
    %86 = vector.shape_cast %85 : vector<128xf32> to vector<1x128xf32>
    %cst_29 = arith.constant dense<0.000000e+00> : vector<1x4xf32>
    %87 = tpu.matmul %86, %3, %cst_29 {dimension_numbers = #tpu.dot_dimension_numbers<[1], [1], [0], [0], [0, 0, 1, 0], [], []>} : vector<1x128xf32>, vector<4x128xf32>, vector<1x4xf32> -> vector<1x4xf32>
    %cst_30 = arith.constant 0.001953125 : f32
    %88 = vector.broadcast %cst_30 : f32 to vector<1x4xf32>
    %89 = arith.mulf %87, %88 : vector<1x4xf32>
    %cst_31 = arith.constant 9.99999974E-6 : f32
    %90 = vector.broadcast %cst_31 : f32 to vector<1x4xf32>
    %91 = arith.addf %89, %90 : vector<1x4xf32>
    %92 = math.rsqrt %91 : vector<1x4xf32>
    %cst_32 = arith.constant dense<0.000000e+00> : vector<1x128xf32>
    %93 = tpu.matmul %92, %3, %cst_32 {dimension_numbers = #tpu.dot_dimension_numbers<[1], [0], [0], [1], [0, 0, 1, 1], [], []>} : vector<1x4xf32>, vector<4x128xf32>, vector<1x128xf32> -> vector<1x128xf32>
    %94 = vector.broadcast %93 : vector<1x128xf32> to vector<16x128xf32>
    %95 = arith.mulf %83, %94 : vector<16x128xf32>
    %96 = vector.shape_cast %73 : vector<128xf32> to vector<1x128xf32>
    %97 = vector.broadcast %96 : vector<1x128xf32> to vector<16x128xf32>
    %98 = arith.mulf %95, %97 : vector<16x128xf32>
    %99 = vector.shape_cast %75 : vector<128xf32> to vector<1x128xf32>
    %100 = vector.broadcast %99 : vector<1x128xf32> to vector<16x128xf32>
    %101 = arith.addf %98, %100 : vector<16x128xf32>
    %cst_33 = arith.constant 1.000000e+00 : f32
    %102 = vector.broadcast %cst_33 : f32 to vector<1x128xf32>
    %103 = arith.addf %102, %66 : vector<1x128xf32>
    %104 = vector.broadcast %103 : vector<1x128xf32> to vector<16x128xf32>
    %105 = arith.mulf %101, %104 : vector<16x128xf32>
    %106 = vector.broadcast %71 : vector<1x128xf32> to vector<16x128xf32>
    %107 = arith.addf %105, %106 : vector<16x128xf32>
    %108 = arith.negf %107 : vector<16x128xf32>
    %109 = math.exp %108 : vector<16x128xf32>
    %cst_34 = arith.constant 1.000000e+00 : f32
    %110 = vector.broadcast %cst_34 : f32 to vector<16x128xf32>
    %111 = arith.addf %110, %109 : vector<16x128xf32>
    %112 = arith.divf %110, %111 : vector<16x128xf32>
    %113 = arith.mulf %107, %112 : vector<16x128xf32>
    %114 = vector.extract_strided_slice %2 {offsets = [5, 0], sizes = [1, 128], strides = [1, 1]} : vector<12x128xf32> to vector<1x128xf32>
    %115 = vector.shape_cast %114 : vector<1x128xf32> to vector<128xf32>
    %cst_35 = arith.constant 0.000000e+00 : f32
    %116 = vector.broadcast %cst_35 : f32 to vector<1x128xf32>
    %117 = tpu.concatenate %116, %113, %116 in 0 : vector<1x128xf32>, vector<16x128xf32>, vector<1x128xf32> -> vector<18x128xf32>
    %118 = vector.extract_strided_slice %117 {offsets = [0, 0], sizes = [16, 128], strides = [1, 1]} : vector<18x128xf32> to vector<16x128xf32>
    %119 = vector.extract_strided_slice %117 {offsets = [2, 0], sizes = [16, 128], strides = [1, 1]} : vector<18x128xf32> to vector<16x128xf32>
    %120 = tpu.concatenate %118, %113, %119 in 1 : vector<16x128xf32>, vector<16x128xf32>, vector<16x128xf32> -> vector<16x384xf32>
    %c0_36 = arith.constant 0 : index
    %c0_37 = arith.constant 0 : index
    %121 = vector.load %arg4[%c0_36, %c0_37] : memref<384x128xf32, #tpu.memory_space<vmem>>, vector<384x128xf32>
    %cst_38 = arith.constant dense<0.000000e+00> : vector<16x128xf32>
    %122 = tpu.matmul %120, %121, %cst_38 {dimension_numbers = #tpu.dot_dimension_numbers<[1], [0], [0], [1], [0, 0, 1, 1], [], []>} : vector<16x384xf32>, vector<384x128xf32>, vector<16x128xf32> -> vector<16x128xf32>
    %123 = vector.shape_cast %115 : vector<128xf32> to vector<1x128xf32>
    %124 = vector.broadcast %123 : vector<1x128xf32> to vector<16x128xf32>
    %125 = arith.addf %122, %124 : vector<16x128xf32>
    %126 = arith.addf %125, %1 : vector<16x128xf32>
    %c0_39 = arith.constant 0 : index
    %c0_40 = arith.constant 0 : index
    %c0_41 = arith.constant 0 : index
    %127 = vector.load %arg7[%c0_39, %c0_40, %c0_41] : memref<1x16x128xf32, #tpu.memory_space<vmem>>, vector<1x16x128xf32>
    %128 = vector.shape_cast %127 : vector<1x16x128xf32> to vector<16x128xf32>
    %129 = vector.shape_cast %126 : vector<16x128xf32> to vector<1x16x128xf32>
    tpu.vector_store %arg7[%c0_39, %c0_40, %c0_41], %129 {strides = array<i32>} : memref<1x16x128xf32, #tpu.memory_space<vmem>>, vector<1x16x128xf32>,
    return
  }
  func.func @transform_0(%arg0: i32) -> (i32, i32, i32) {
    %c0_i32 = arith.constant 0 : i32
    %c0_i32_0 = arith.constant 0 : i32
    %c0_i32_1 = arith.constant 0 : i32
    return %arg0, %c0_i32, %c0_i32_0 : i32, i32, i32
  }
  func.func @transform_1(%arg0: i32) -> (i32, i32, i32) {
    %c0_i32 = arith.constant 0 : i32
    %c0_i32_0 = arith.constant 0 : i32
    %c0_i32_1 = arith.constant 0 : i32
    return %arg0, %c0_i32, %c0_i32_0 : i32, i32, i32
  }
  func.func @transform_2(%arg0: i32) -> (i32, i32) {
    %c0_i32 = arith.constant 0 : i32
    %c0_i32_0 = arith.constant 0 : i32
    %c0_i32_1 = arith.constant 0 : i32
    return %c0_i32, %c0_i32_0 : i32, i32
  }
  func.func @transform_3(%arg0: i32) -> (i32, i32) {
    %c0_i32 = arith.constant 0 : i32
    %c0_i32_0 = arith.constant 0 : i32
    %c0_i32_1 = arith.constant 0 : i32
    return %c0_i32, %c0_i32_0 : i32, i32
  }
  func.func @transform_4(%arg0: i32) -> (i32, i32) {
    %c0_i32 = arith.constant 0 : i32
    %c0_i32_0 = arith.constant 0 : i32
    %c0_i32_1 = arith.constant 0 : i32
    return %c0_i32, %c0_i32_0 : i32, i32
  }
  func.func @transform_5(%arg0: i32) -> (i32, i32) {
    %c0_i32 = arith.constant 0 : i32
    %c0_i32_0 = arith.constant 0 : i32
    %c0_i32_1 = arith.constant 0 : i32
    return %c0_i32, %c0_i32_0 : i32, i32
  }
  func.func @transform_6(%arg0: i32) -> (i32, i32, i32) {
    %c0_i32 = arith.constant 0 : i32
    %c0_i32_0 = arith.constant 0 : i32
    %c0_i32_1 = arith.constant 0 : i32
    return %arg0, %c0_i32, %c0_i32_0 : i32, i32, i32
  }
}

</mosaic_0001>

<bundles_post_ra>
// kernel: tpu_custom_call.1
= control target key start
LH: loop header
LB: loop body
LE: loop exit
PB: predicated region body
PF: predicated region fallthrough
CT: control target
= control target key end

     0   :  { %11 = vsyncpa [#allocation3], 0  ;;  %s2870_s0 = inlined_call_operand.hbm [shape: f32[2,16,128], index: 0, kind: input, shape index: {}]   ;;  %s2871_s1 = inlined_call_operand.vmem [shape: f32[2,1,16], index: 1, kind: input, shape index: {}]   ;;  %s2872_s2 = inlined_call_operand.hbm [shape: f32[384,128], index: 2, kind: input, shape index: {}]   ;;  %s2873_s3 = inlined_call_operand.hbm [shape: f32[384,128], index: 3, kind: input, shape index: {}]   ;;  %s2874_s4 = inlined_call_operand.hbm [shape: f32[16,256], index: 4, kind: input, shape index: {}]   ;;  %s2875_s5 = inlined_call_operand.vmem [shape: f32[12,128], index: 5, kind: input, shape index: {}]   ;;  %s2876_s6 = inlined_call_operand.hbm [shape: f32[2,16,128], index: 6, kind: output, shape index: {}]  }
   0x1   :  { %13 = vsyncpa [#allocation3 + $0x1], 0 }
   0x2   :  { %14 = vsyncpa [#allocation6], 0 }
   0x3   :  { %15 = vsyncpa [#allocation9], 0 }
   0x4   :  { %16 = vsyncpa [#allocation4], 0 }
   0x5   :  { %18 = vsyncpa [#allocation4 + $0x1], 0  ;;  %s2462_s21 = smov 0   ;;  %s2464_s22 = smov 0  }
   0x6   :  { %s2466_s23 = smov 0   ;;  %s2468_s24 = smov 0  }
   0x7 LB: > { %s2483_s25 = sadd.s32 4294967295, %s2412_s24   ;;  %s1705_s26 = sadd.s32 4294967294, %s2412_s24   ;;  %s2412_s24 = sphi %s2468_s24, %s2901_s24   ;;  %s2408_s23 = sphi %s2466_s23, %s2900_s23   ;;  %s2404_s22 = sphi %s2464_s22, %s2899_s22   ;;  %s2400_s21 = sphi %s2462_s21, %s2898_s21  }
   0x8   : > { %p44_p0 = scmp.ne.s32.totalorder %s2404_s22, %s2400_s21  ;;  %p2877_p1 = scmp.eq.s32.totalorder %s2483_s25, 0 }
   0x9   : > { %p184_p3 = scmp.eq.s32.totalorder %s1705_s26, 1  ;;  %p1706_p5 = scmp.ge.s32.totalorder %s2412_s24, 1 }
   0xa   : > { %p2492_p4 = por %p2877_p1, %p44_p0  ;;  %p191_p7 = scmp.lt.s32.totalorder %s2412_s24, 3 }
   0xb   : > { %p2497_p6 = por %p184_p3, %p44_p0  ;;  %s2414_s30 = smov [#allocation5]  }
   0xc   : > { %s2880_s27 = scalar_select %p2492_p4, 1, 0 }
   0xd   : > { %s2881_s28 = scalar_select %p2497_p6, 1, 0 }
   0xe   : > { %p2502_p8 = pnand %p1706_p5, %p191_p7  ;;  %s203_s7 = sshll.u32 %s2414_s30, 4  ;;  %s2506_s7 = int_to_ptr.vmem [resolvable:$true] %s203_s7 }
   0xf   : > { %s2415_s9 = smov [#allocation7]   ;;  %s2416_s11 = smov [#allocation8]  }
  0x10   : > { %s2882_s29 = scalar_select %p2502_p8, 1, 0 }
  0x11   : > { %p2131_p9 = pneg %p2502_p8  ;;  %s216_s10 = sshll.u32 %s2415_s9, 4  ;;  %s2517_s10 = int_to_ptr.vmem [resolvable:$true] %s216_s10 }
  0x12   : > { %s2519_s12 = sshll.u32 %s2416_s11, 4  ;;  %s2224_s15 = scalar_lea.hbm %s2872_s2, 6144  ;;  %s230_s12 = int_to_ptr.vmem [resolvable:$true] %s2519_s12 }
  0x13   : > { %p2513_p11 = pnand %p2131_p9, %p2877_p1  ;;  %p2225_p12 = scmp.ne.s32.totalorder %s2872_s2, %s2224_s15 }
  0x14   : > { %p2231_p5 = scmp.lt.u32.totalorder %s2224_s15, %s2872_s2 }
  0x15   : > { %p2529_p13 = pneg %p2513_p11 }
  0x17   : > { %p2227_p0 = pnand %p2529_p13, %p2225_p12 }
  0x19   : > { %p2228_p3 = pneg %p2227_p0 }
  0x1b   : > { %p2233_p7 = pnand %p2231_p5, %p2228_p3 }
  0x1d   : > { %2236 = shalt.err (!%p2233_p7)
}
  0x1e   : > { %s2237_s26 = scalar_lea.vmem %s2506_s7, 6144  ;;  %p2245_p2 = scmp.lt.s32.totalorder %s2506_s7, %s2506_s7 }
  0x1f   : > { %p2238_p9 = scmp.ne.s32.totalorder %s2506_s7, %s2237_s26  ;;  %p2246_p6 = scmp.lt.s32.totalorder %s2237_s26, %s2237_s26 }
  0x21   : > { %p2240_p10 = pnand %p2238_p9, %p2529_p13  ;;  %p2247_p12 = por %p2246_p6, %p2245_p2 }
  0x23   : > { %p2241_p1 = pneg %p2240_p10 }
  0x25   : > { %p2248_p0 = pnand %p2247_p12, %p2241_p1 }
  0x27   : > { %2251 = shalt.err (!%p2248_p0)
}
  0x28   : > { %s2417_s30 = smov 128   ;;  %s2418_s9 = smov 8  }
  0x29   : > { %2134 = dma.hbm_to_vmem [thread:$0]  (!%p2513_p11), %s2872_s2, 6144, %s2506_s7, [#allocation6], %s2417_s30, %s2417_s30, %s2418_s9  }
  0x2a   : > { %s2252_s16 = scalar_lea.hbm %s2873_s3, 6144 }
  0x2b   : > { %p2253_p1 = scmp.ne.s32.totalorder %s2873_s3, %s2252_s16  ;;  %p2259_p10 = scmp.lt.u32.totalorder %s2252_s16, %s2873_s3 }
  0x2d   : > { %p2255_p2 = pnand %p2253_p1, %p2529_p13 }
  0x2f   : > { %p2256_p6 = pneg %p2255_p2 }
  0x31   : > { %p2261_p3 = pnand %p2259_p10, %p2256_p6 }
  0x33   : > { %2264 = shalt.err (!%p2261_p3)
}
  0x34   : > { %s2265_s7 = scalar_lea.vmem %s2517_s10, 6144  ;;  %p2273_p12 = scmp.lt.s32.totalorder %s2517_s10, %s2517_s10 }
  0x35   : > { %p2266_p5 = scmp.ne.s32.totalorder %s2517_s10, %s2265_s7  ;;  %p2274_p0 = scmp.lt.s32.totalorder %s2265_s7, %s2265_s7 }
  0x37   : > { %p2268_p7 = pnand %p2266_p5, %p2529_p13  ;;  %p2275_p1 = por %p2274_p0, %p2273_p12 }
  0x39   : > { %p2269_p9 = pneg %p2268_p7 }
  0x3b   : > { %p2276_p2 = pnand %p2275_p1, %p2269_p9 }
  0x3d   : > { %2279 = shalt.err (!%p2276_p2)
}
  0x3e   : > { %2137 = dma.hbm_to_vmem [thread:$0]  (!%p2513_p11), %s2873_s3, 6144, %s2517_s10, [#allocation6], %s2417_s30, %s2417_s30, %s2418_s9  }
  0x3f   : > { %s2280_s16 = scalar_lea.hbm %s2874_s4, 512 }
  0x40   : > { %p2281_p6 = scmp.ne.s32.totalorder %s2874_s4, %s2280_s16  ;;  %p2287_p5 = scmp.lt.u32.totalorder %s2280_s16, %s2874_s4 }
  0x42   : > { %p2283_p10 = pnand %p2281_p6, %p2529_p13 }
  0x44   : > { %p2284_p3 = pneg %p2283_p10 }
  0x46   : > { %p2289_p7 = pnand %p2287_p5, %p2284_p3 }
  0x48   : > { %2292 = shalt.err (!%p2289_p7)
}
  0x49   : > { %s2293_s7 = scalar_lea.vmem %s230_s12, 512  ;;  %p2301_p1 = scmp.lt.s32.totalorder %s230_s12, %s230_s12 }
  0x4a   : > { %p2294_p9 = scmp.ne.s32.totalorder %s230_s12, %s2293_s7  ;;  %p2302_p2 = scmp.lt.s32.totalorder %s2293_s7, %s2293_s7 }
  0x4c   : > { %p2296_p12 = pnand %p2294_p9, %p2529_p13  ;;  %p2303_p4 = por %p2302_p2, %p2301_p1 }
  0x4e   : > { %p2297_p0 = pneg %p2296_p12 }
  0x50   : > { %p2304_p8 = pnand %p2303_p4, %p2297_p0 }
  0x52   : > { %2307 = shalt.err (!%p2304_p8)
}
  0x53   : > { %s2419_s10 = smov 256   ;;  %s2420_s18 = smov 16  }
  0x54   : > { %2140 = dma.hbm_to_vmem [thread:$0]  (!%p2513_p11), %s2874_s4, 512, %s230_s12, [#allocation9], %s2419_s10, %s2419_s10, %s2420_s18  }
  0x55   : > { %s2599_s14 = sadd.s32 1, %s2412_s24   ;;  %s31_s16 = sadd.s32 1, %s2408_s23 }
  0x56   : > { %s28_s15 = ssub.s32 %s2412_s24, %s2599_s14  ;;  %p38_p8 = scmp.ne.s32.totalorder %s2408_s23, %s2404_s22 }
  0x57   : > { %p29_p4 = scmp.eq.s32.totalorder %s28_s15, 0  ;;  %p39_p13 = scmp.eq.s32.totalorder %s2412_s24, 0 }
  0x58   : > { %p2152_p6 = scmp.lt.s32.totalorder %s2412_s24, 2  ;;  %p2885_p3 = scmp.eq.s32.totalorder %s2483_s25, 1 }
  0x59   : > { %s2609_s17 = scalar_select %p29_p4, %s2408_s23, %s31_s16  }
  0x5a   : > { %p40_p10 = por %p39_p13, %p38_p8  ;;  %p2613_p5 = por %p2885_p3, %p38_p8 }
  0x5b   : > { %s246_s8 = sand.u32 1, %s2408_s23   ;;  %s1743_s20 = sshll.u32 %s2412_s24, 8 }
  0x5c   : > { %s1711_s12 = sshll.u32 %s246_s8, 4  ;;  %s2622_s10 = scalar_lea.hbm %s2870_s0, %s1743_s20 }
  0x5d   : > { %s250_s18 = scalar_lea.vmem [#allocation2], %s1711_s12  ;;  %p2624_p11 = pnand %p2152_p6, %p40_p10 }
  0x5e   : > { %s257_s11 = sshll.u32 %s250_s18, 4  ;;  %s2630_s15 = scalar_lea.sflag [#allocation3], %s246_s8  ;;  %s2628_s11 = int_to_ptr.vmem [resolvable:$true] %s257_s11 }
  0x5f   : > { %s2308_s16 = scalar_lea.hbm %s2622_s10, 256  ;;  %p2310_p9 = pneg %p2624_p11 }
  0x60   : > { %p2309_p7 = scmp.ne.s32.totalorder %s2622_s10, %s2308_s16  ;;  %s2313_s26 = scalar_lea.hbm %s2870_s0, 512 }
  0x61   : > { %p2314_p1 = scmp.lt.u32.totalorder %s2622_s10, %s2870_s0  ;;  %p2315_p2 = scmp.lt.u32.totalorder %s2313_s26, %s2308_s16 }
  0x62   : > { %p2311_p12 = pnand %p2310_p9, %p2309_p7  ;;  %p2317_p8 = scmp.lt.u32.totalorder %s2308_s16, %s2622_s10 }
  0x63   : > { %p2316_p4 = por %p2315_p2, %p2314_p1 }
  0x64   : > { %p2312_p0 = pneg %p2311_p12 }
  0x65   : > { %p2318_p13 = por %p2317_p8, %p2316_p4 }
  0x67   : > { %p2319_p6 = pnand %p2318_p13, %p2312_p0 }
  0x69   : > { %2322 = shalt.err (!%p2319_p6)
}
  0x6a   : > { %s2323_s8 = scalar_lea.vmem %s2628_s11, 256  ;;  %s2421_s20 = smov [#allocation2]  }
  0x6b   : > { %p2324_p10 = scmp.ne.s32.totalorder %s2628_s11, %s2323_s8  ;;  %s2328_s12 = sshll.u32 %s2421_s20, 4  ;;  %s2329_s12 = int_to_ptr.vmem [resolvable:$false] %s2328_s12 }
  0x6c   : > { %s2330_s7 = scalar_lea.vmem %s2329_s12, 512  ;;  %p2331_p12 = scmp.lt.s32.totalorder %s2628_s11, %s2329_s12 }
  0x6d   : > { %p2326_p3 = pnand %p2324_p10, %p2310_p9  ;;  %p2332_p1 = scmp.lt.s32.totalorder %s2330_s7, %s2323_s8 }
  0x6f   : > { %p2327_p7 = pneg %p2326_p3  ;;  %p2333_p2 = por %p2332_p1, %p2331_p12 }
  0x71   : > { %p2334_p4 = pnand %p2333_p2, %p2327_p7 }
  0x73   : > { %2337 = shalt.err (!%p2334_p4)
}
  0x74   : > { %2144 = dma.hbm_to_vmem [thread:$0]  (!%p2624_p11), %s2622_s10, 256, %s2628_s11, %s2630_s15, %s2417_s30, %s2417_s30, %s2418_s9  }
  0x75   : > { %p2888_p9 = scmp.ne.s32.totalorder %s2882_s29, 0 }
  0x76   : > { %s2664_s16 = sand.u32 (!%p2888_p9), 1, %s2404_s22   ;;  %p2889_p0 = scmp.ne.s32.totalorder (!%p2888_p9), %s2880_s27, 0 }
  0x77   : > { %275 = sbr.rel (%p2888_p9) target bundleno = 2477 (0x9ad), region = 44  ;;  %s1715_s26 = sshll.u32 (!%p2888_p9), %s2664_s16, 4 }
  0x78   : > { %s278_s18 = scalar_lea.sflag (!%p2888_p9), [#allocation3], %s2664_s16  ;;  %s281_s13 = scalar_lea.vmem (!%p2888_p9), [#allocation2], %s1715_s26 }
  0x7e   : > { %2383 = dma.done.wait (%p2889_p0), %s278_s18, 256  }
  0x7f   : > { %2385 = vsyncadd (%p2889_p0), %s278_s18, 4294967040  ;;  %p2890_p11 = scmp.eq.s32.totalorder %s2483_s25, 0 }
  0x81   : > { %2387 = dma.done.wait (%p2890_p11), [#allocation6], 12288   ;;  %p2891_p8 = pmov %p2890_p11 }
  0x83   : > { %2389 = vsyncadd (%p2891_p8), [#allocation6], 4294955008  ;;  %p2892_p13 = pmov %p2891_p8 }
  0x84   : > { %p2893_p6 = pmov %p2891_p8 }
  0x85   : > { %2391 = dma.done.wait (%p2892_p13), [#allocation9], 512  }
  0x86   : > { %2393 = vsyncadd (%p2893_p6), [#allocation9], 4294966784  ;;  %v2422_v0 = vmov 0.0   ;;  %vm2423_vm0 = vmmov 0   ;;  %v2691_v1 = vld [vmem:[%s2875_s5 + $0x8] sm:$0xf]  ;;  %v488_v14 = vlaneseq }
  0x87   : > { %1873 = vmatprep.subr.mxu0 %v2422_v0  ;;  %1875 = vmatprep.mubr.msk.f32.mxu0 %vm2423_vm0, %v2422_v0  ;;  %v2693_v2 = vld [vmem:[%s281_s13] sm:$0xff]  ;;  %v2695_v3 = vld [vmem:[%s281_s13 + $0x8] sm:$0xff]  ;;  %vm414_vm1 = vcmask 1043456   ;;  %vm410_vm2 = vcmask 31744   ;;  %vm683_vm3 = vcmask 1040384   ;;  %vm694_vm5 = vcmask 1045504  }
  0x88   : > { %1878 = vmatprep.subr.mxu1 %v2422_v0  ;;  %1880 = vmatprep.mubr.msk.f32.mxu1 %vm2423_vm0, %v2422_v0  ;;  %v332_v4 = vadd.f32 %v2695_v3, %v2693_v2  ;;  %v2712_v15 = vshrl.u32 %v488_v14, 7  ;;  %v718_v36 = vld [vmem:[#allocation5 + $0x80] sm:$0xff]  ;;  %v719_v37 = vld [vmem:[#allocation5 + $0x88] sm:$0xff]  ;;  %v720_v41 = vld [vmem:[#allocation5 + $0x90] sm:$0xff]  ;;  %p325_p10 = scmp.lt.s32.totalorder %s2483_s25, 1  ;;  %vm916_vm6 = vcmask 130048  }
  0x89   : > { %1874 = vmatpush3.xpose.msra.mxu0 %v2691_v1  ;;  %1879 = vmatpush3.msk.msra.mxu1 %vm414_vm1, %v2691_v1  ;;  %v1983_v38 = vpack.c.bf16 %v719_v37, %v718_v36  ;;  %v702_v39 = vld [vmem:[#allocation5] sm:$0xff]  ;;  %v703_v40 = vld [vmem:[#allocation5 + $0x8] sm:$0xff]  ;;  %v721_v43 = vld [vmem:[#allocation5 + $0x98] sm:$0xff]  ;;  %s324_s20 = scalar_lea.vmem [#allocation10], %s1715_s26  ;;  %s1744_s7 = sshll.u32 %s2483_s25, 8 }
  0x8a   : > { %1888 = vmatprep.subr.mxu0 %v2422_v0  ;;  %v333_v5 = vrot.slane %v332_v4, 4  ;;  %1883 = vmatprep.subr.mxu1 %v2422_v0  ;;  %v2715_v16 = vsub.s32 0, %v2712_v15  ;;  %v1985_v42 = vpack.c.bf16 %v703_v40, %v702_v39  ;;  %v704_v44 = vld [vmem:[#allocation5 + $0x10] sm:$0xff]  ;;  %v705_v45 = vld [vmem:[#allocation5 + $0x18] sm:$0xff]  ;;  %v1987_v46 = vpack.c.bf16 %v721_v43, %v720_v41  ;;  %v734_v47 = vld [vmem:[#allocation5 + $0x100] sm:$0xff]  ;;  %s326_s10 = scalar_select %p325_p10, %s2483_s25, 1 }
  0x8b   : > { %v735_v48 = vld [vmem:[#allocation5 + $0x108] sm:$0xff]  ;;  %v722_v49 = vld [vmem:[#allocation5 + $0xa0] sm:$0xff]  ;;  %v1989_v50 = vpack.c.bf16 %v705_v45, %v704_v44  ;;  %v736_v56 = vld [vmem:[#allocation5 + $0x110] sm:$0xff]  ;;  %s1594_s12 = sshll.u32 %s324_s20, 4  ;;  %s2825_s27 = scalar_lea.hbm %s2876_s6, %s1744_s7  ;;  %s2820_s12 = int_to_ptr.vmem [resolvable:$true] %s1594_s12 }
  0x8c   : > { %v334_v6 = vadd.f32 %v333_v5, %v332_v4  ;;  %v2015_v51 = vpack.c.bf16 %v735_v48, %v734_v47  ;;  %v723_v52 = vld [vmem:[#allocation5 + $0xa8] sm:$0xff]  ;;  %v706_v53 = vld [vmem:[#allocation5 + $0x20] sm:$0xff]  ;;  %v737_v57 = vld [vmem:[#allocation5 + $0x118] sm:$0xff]  ;;  %s327_s8 = scalar_lea.vmem %s2871_s1, %s326_s10  ;;  %s1581_s26 = scalar_lea.sflag [#allocation4], %s2664_s16 }
  0x8d   : > { %v1991_v54 = vpack.c.bf16 %v723_v52, %v722_v49  ;;  %v707_v55 = vld [vmem:[#allocation5 + $0x28] sm:$0xff]  ;;  %v2019_v58 = vpack.c.bf16 %v737_v57, %v736_v56  ;;  %v724_v59 = vld [vmem:[#allocation5 + $0xb0] sm:$0xff]  ;;  %v725_v60 = vld [vmem:[#allocation5 + $0xb8] sm:$0xff]  ;;  %s2338_s29 = scalar_lea.vmem %s2820_s12, 256  ;;  %s2424_s25 = smov [#allocation10]  }
  0x8e   : > { %v335_v7 = vrot.slane %v334_v6, 2  ;;  %v738_v61 = vld [vmem:[#allocation5 + $0x120] sm:$0xff]  ;;  %v739_v62 = vld [vmem:[#allocation5 + $0x128] sm:$0xff]  ;;  %v1993_v63 = vpack.c.bf16 %v707_v55, %v706_v53  ;;  %v708_v4 = vld [vmem:[#allocation5 + $0x30] sm:$0xff]  ;;  %v663_v53 = vsub.s32 1, %v2712_v15  ;;  %p2339_p3 = scmp.ne.s32.totalorder %s2820_s12, %s2338_s29  ;;  %s2342_s30 = sshll.u32 %s2424_s25, 4  ;;  %s2343_s30 = int_to_ptr.vmem [resolvable:$false] %s2342_s30 }
  0x8f   : > { %v2023_v5 = vpack.c.bf16 %v739_v62, %v738_v61  ;;  %v746_v39 = vld [vmem:[#allocation5 + $0x160] sm:$0xff]  ;;  %v747_v40 = vld [vmem:[#allocation5 + $0x168] sm:$0xff]  ;;  %v732_v41 = vld [vmem:[#allocation5 + $0xf0] sm:$0xff]  ;;  %s2344_s9 = scalar_lea.vmem %s2343_s30, 512  ;;  %p2345_p1 = scmp.lt.s32.totalorder %s2820_s12, %s2343_s30 }
  0x90   : > { %v336_v8 = vadd.f32 %v335_v7, %v334_v6  ;;  %v1995_v6 = vpack.c.bf16 %v725_v60, %v724_v59  ;;  %v709_v7 = vld [vmem:[#allocation5 + $0x38] sm:$0xff]  ;;  %v2039_v44 = vpack.c.bf16 %v747_v40, %v746_v39  ;;  %v748_v49 = vld [vmem:[#allocation5 + $0x170] sm:$0xff]  ;;  %v2733_v52 = vld [vmem:[%s2875_s5] sm:$0xff]  ;;  %v752_v40 = vsub.s32 2, %v2712_v15  ;;  %p2340_p7 = pnand %p2339_p3, %p2613_p5  ;;  %p2346_p2 = scmp.lt.s32.totalorder %s2344_s9, %s2338_s29 }
  0x91   : > { %v717_v47 = vld [vmem:[#allocation5 + $0x78] sm:$0xff]  ;;  %v658_v56 = vrot.slane %v2733_v52, %v2715_v16  ;;  %v664_v60 = vrot.slane %v2733_v52, %v663_v53  ;;  %vm2743_vm4 = vmneg %vm683_vm3 }
  0x92   : > { %v337_v9 = vrot.slane %v336_v8, 1  ;;  %p2341_p12 = pneg %p2340_p7  ;;  %p2347_p4 = por %p2346_p2, %p2345_p1 }
  0x94   : > { %v338_v10 = vadd.f32 %v337_v9, %v336_v8  ;;  %v740_v8 = vld [vmem:[#allocation5 + $0x130] sm:$0xff]  ;;  %v741_v9 = vld [vmem:[#allocation5 + $0x138] sm:$0xff]  ;;  %p2348_p9 = pnand %p2347_p4, %p2341_p12 }
  0x95   : > { %v2027_v14 = vpack.c.bf16 %v741_v9, %v740_v8 }
  0x96   : > { %1876 = vmatmul.mubr.f32.vlgmr.msra.gmra.mrb[0].mxu0 %v338_v10  ;;  %v726_v10 = vld [vmem:[#allocation5 + $0xc0] sm:$0xff] }
  0x97   : > { %1890 = vmatprep.mubr.msk.f32.mxu0 %vm2423_vm0, %v2422_v0  ;;  %1889 = vmatpush3.msk.msra.mxu0 %vm414_vm1, %v2691_v1 }
  0x98   : > { %2016 = vmatprep.subr.bf16.mxu0 %v2015_v51 }
 0x169   : > { %v405_v11 = vpop.f32.mrb[0].mxu0 }
 0x16a   : > { %v409_v12 = vmul.f32 0.001953125, %v405_v11  ;;  %v1877_v13 = vpop.f32.mrb[1].mxu0  ;;  %v727_v11 = vld [vmem:[#allocation5 + $0xc8] sm:$0xff] }
 0x16b   : > { %v710_v13 = vld [vmem:[#allocation5 + $0x40] sm:$0xff] }
 0x16c   : > { %1881 = vmatmul.mubr.msk.f32.vlgmr.msra.gmra.mrb[0].mxu1 %vm410_vm2, %v409_v12  ;;  %v1997_v12 = vpack.c.bf16 %v709_v7, %v708_v4 }
 0x16d   : > { %1884 = vmatpush3.xpose.msra.mxu1 %v2691_v1  ;;  %1885 = vmatprep.mubr.msk.f32.mxu1 %vm2423_vm0, %v2422_v0 }
 0x16e   : > { %1984 = vmatprep.subr.bf16.mxu1 %v1983_v38  ;;  %v715_v38 = vld [vmem:[#allocation5 + $0x68] sm:$0xff] }
 0x23f   : > { %v484_v17 = vpop.f32.mrb[0].mxu1 }
 0x240   : > { %v491_v18 = vrot.slane %v484_v17, %v2715_v16  ;;  %v1882_v19 = vpop.f32.mrb[1].mxu1  ;;  %v1999_v17 = vpack.c.bf16 %v727_v11, %v726_v10 }
 0x241   : > { %v742_v19 = vld [vmem:[#allocation5 + $0x140] sm:$0xff] }
 0x242   : > { %v2719_v20 = vsub.f32 %v2693_v2, %v491_v18  ;;  %v2722_v21 = vsub.f32 %v2695_v3, %v491_v18  ;;  %v711_v18 = vld [vmem:[#allocation5 + $0x48] sm:$0xff] }
 0x244   : > { %v494_v22 = vmul.f32 %v2719_v20, %v2719_v20  ;;  %v495_v23 = vmul.f32 %v2722_v21, %v2722_v21 }
 0x246   : > { %v496_v24 = vadd.f32 %v495_v23, %v494_v22  ;;  %v743_v22 = vld [vmem:[#allocation5 + $0x148] sm:$0xff]  ;;  %v728_v23 = vld [vmem:[#allocation5 + $0xd0] sm:$0xff] }
 0x248   : > { %v497_v25 = vrot.slane %v496_v24, 4 }
 0x24a   : > { %v498_v26 = vadd.f32 %v497_v25, %v496_v24  ;;  %v729_v24 = vld [vmem:[#allocation5 + $0xd8] sm:$0xff]  ;;  %v2001_v25 = vpack.c.bf16 %v711_v18, %v710_v13 }
 0x24c   : > { %v499_v27 = vrot.slane %v498_v26, 2 }
 0x24e   : > { %v500_v28 = vadd.f32 %v499_v27, %v498_v26  ;;  %v712_v26 = vld [vmem:[#allocation5 + $0x50] sm:$0xff]  ;;  %v2031_v27 = vpack.c.bf16 %v743_v22, %v742_v19 }
 0x250   : > { %v501_v29 = vrot.slane %v500_v28, 1 }
 0x252   : > { %v502_v30 = vadd.f32 %v501_v29, %v500_v28  ;;  %v2003_v28 = vpack.c.bf16 %v729_v24, %v728_v23  ;;  %v713_v29 = vld [vmem:[#allocation5 + $0x58] sm:$0xff] }
 0x254   : > { %1886 = vmatmul.mubr.f32.vlgmr.msra.gmra.mrb[2].mxu1 %v502_v30  ;;  %v744_v30 = vld [vmem:[#allocation5 + $0x150] sm:$0xff] }
 0x255   : > { %1986 = vmatpush3.bf16.msra.mxu1 %v1985_v42  ;;  %v733_v42 = vld [vmem:[#allocation5 + $0xf8] sm:$0xff] }
 0x256   : > { %1988 = vmatprep.subr.bf16.mxu1 %v1987_v46  ;;  %v2011_v45 = vpack.c.bf16 %v733_v42, %v732_v41  ;;  %v716_v46 = vld [vmem:[#allocation5 + $0x70] sm:$0xff]  ;;  %v753_v42 = vrot.slane %v2733_v52, %v752_v40  ;;  %v1394_v40 = vld [vmem:[#allocation7 + $0xa0] sm:$0xff] }
 0x257   : > { %v2013_v48 = vpack.c.bf16 %v717_v47, %v716_v46 }
 0x259   : > { %1990 = vmatpush3.bf16.msra.mxu1 %v1989_v50  ;;  %v749_v50 = vld [vmem:[#allocation5 + $0x178] sm:$0xff] }
 0x25a   : > { %1992 = vmatprep.subr.bf16.mxu1 %v1991_v54 }
 0x25d   : > { %1994 = vmatpush3.bf16.msra.mxu1 %v1993_v63 }
 0x25e   : > { %1996 = vmatprep.subr.bf16.mxu1 %v1995_v6 }
 0x261   : > { %1998 = vmatpush3.bf16.msra.mxu1 %v1997_v12  ;;  %v1424_v12 = vsub.s32 5, %v2712_v15 }
 0x262   : > { %2000 = vmatprep.subr.bf16.mxu1 %v1999_v17 }
 0x265   : > { %2002 = vmatpush3.bf16.msra.mxu1 %v2001_v25 }
 0x266   : > { %2004 = vmatprep.subr.bf16.mxu1 %v2003_v28  ;;  %v913_v28 = vld [vmem:[#allocation8 + $0x8] sm:$0xff] }
 0x327   : > { %v569_v31 = vpop.f32.mrb[2].mxu1 }
 0x328   : > { %v573_v32 = vmul.f32 0.001953125, %v569_v31  ;;  %v1887_v33 = vpop.f32.mrb[3].mxu1  ;;  %v745_v31 = vld [vmem:[#allocation5 + $0x158] sm:$0xff] }
 0x329   : > { %v731_v33 = vld [vmem:[#allocation5 + $0xe8] sm:$0xff]  ;;  %v2035_v36 = vpack.c.bf16 %v745_v31, %v744_v30  ;;  %v912_v30 = vld [vmem:[#allocation8] sm:$0xff] }
 0x32a   : > { %v574_v34 = vadd.f32 1e-05, %v573_v32  ;;  %v730_v32 = vld [vmem:[#allocation5 + $0xe0] sm:$0xff] }
 0x32b   : > { %v2007_v37 = vpack.c.bf16 %v731_v33, %v730_v32  ;;  %v914_v32 = vld [vmem:[#allocation8 + $0x10] sm:$0xff] }
 0x32c   : > { %2200 = vrsqrt.f32 %v574_v34  ;;  %v2005_v34 = vpack.c.bf16 %v713_v29, %v712_v26  ;;  %v915_v29 = vld [vmem:[#allocation8 + $0x18] sm:$0xff]  ;;  %v2049_v33 = vpack.c.bf16 %v914_v32, %v912_v30  ;;  %v1392_v32 = vld [vmem:[#allocation7 + $0x90] sm:$0xff] }
 0x32d   : > { %v2047_v31 = vpack.c.bf16 %v915_v29, %v913_v28  ;;  %v1391_v28 = vld [vmem:[#allocation7 + $0x88] sm:$0xff]  ;;  %v1374_v29 = vld [vmem:[#allocation7] sm:$0xff] }
 0x32e   : > { %2006 = vmatpush3.bf16.msra.mxu1 %v2005_v34  ;;  %v904_v34 = vld [vmem:[%s327_s8] sm:$0x1] }
 0x32f   : > { %2008 = vmatprep.subr.bf16.mxu1 %v2007_v37 }
 0x336   : > { %v2201_v35 = vpop.eup %2200 }
 0x337   : > { %1891 = vmatmul.mubr.msk.f32.vlgmr.msra.gmra.mrb[2].mxu0 %vm410_vm2, %v2201_v35  ;;  %v714_v35 = vld [vmem:[#allocation5 + $0x60] sm:$0xff] }
 0x338   : > { %2018 = vmatpush3.bf16.msra.mxu0 %v2015_v51  ;;  %v2009_v43 = vpack.c.bf16 %v715_v38, %v714_v35  ;;  %v2043_v51 = vpack.c.bf16 %v749_v50, %v748_v49  ;;  %v1728_v35 = vmul.f32 -1.442695, %v904_v34 }
 0x339   : > { %2020 = vmatprep.subr.bf16.mxu0 %v2019_v58 }
 0x33a   : > { %2010 = vmatpush3.bf16.msra.mxu1 %v2009_v43 }
 0x33b   : > { %2012 = vmatprep.subr.bf16.mxu1 %v2011_v45 }
 0x33c   : > { %2022 = vmatpush3.bf16.msra.mxu0 %v2019_v58 }
 0x33d   : > { %2024 = vmatprep.subr.bf16.mxu0 %v2023_v5 }
 0x33e   : > { %2014 = vmatpush3.bf16.msra.mxu1 %v2013_v48 }
 0x33f   : > { %1928 = vmatprep.subr.mxu1 %v2422_v0 }
 0x340   : > { %2026 = vmatpush3.bf16.msra.mxu0 %v2023_v5 }
 0x341   : > { %2028 = vmatprep.subr.bf16.mxu0 %v2027_v14 }
 0x344   : > { %2030 = vmatpush3.bf16.msra.mxu0 %v2027_v14 }
 0x345   : > { %2032 = vmatprep.subr.bf16.mxu0 %v2031_v27 }
 0x348   : > { %2034 = vmatpush3.bf16.msra.mxu0 %v2031_v27 }
 0x349   : > { %2036 = vmatprep.subr.bf16.mxu0 %v2035_v36 }
 0x34c   : > { %2038 = vmatpush3.bf16.msra.mxu0 %v2035_v36 }
 0x34d   : > { %2040 = vmatprep.subr.bf16.mxu0 %v2039_v44 }
 0x350   : > { %2042 = vmatpush3.bf16.msra.mxu0 %v2039_v44 }
 0x351   : > { %2044 = vmatprep.subr.bf16.mxu0 %v2043_v51 }
 0x354   : > { %2046 = vmatpush3.bf16.msra.mxu0 %v2043_v51 }
 0x355   : > { %2048 = vmatprep.subr.bf16.mxu0 %v2047_v31  ;;  %v1375_v31 = vld [vmem:[#allocation7 + $0x8] sm:$0xff] }
 0x40a   : > { %v645_v54 = vpop.f32.mrb[2].mxu0 }
 0x40b   : > { %v652_v55 = vrot.slane %v645_v54, %v2715_v16  ;;  %v1892_v57 = vpop.f32.mrb[3].mxu0 }
 0x40d   : > { %v653_v58 = vmul.f32 %v652_v55, %v2719_v20  ;;  %v654_v59 = vmul.f32 %v652_v55, %v2722_v21 }
 0x40f   : > { %v659_v61 = vmul.f32 %v658_v56, %v653_v58  ;;  %v660_v62 = vmul.f32 %v658_v56, %v654_v59 }
 0x411   : > { %v665_v63 = vadd.f32 %v664_v60, %v659_v61  ;;  %v666_v4 = vadd.f32 %v664_v60, %v660_v62 }
 0x413   : > { %v1724_v5 = vmul.f32 -1.442695, %v665_v63  ;;  %v1725_v6 = vmul.f32 -1.442695, %v666_v4 }
 0x415   : > { %2202 = vpow2.f32 %v1724_v5 }
 0x416   : > { %2204 = vpow2.f32 %v1725_v6 }
 0x41f   : > { %v2203_v7 = vpop.eup %2202 }
 0x420   : > { %v2205_v8 = vpop.eup %2204  ;;  %v673_v9 = vadd.f32 1.0, %v2203_v7 }
 0x421   : > { %v674_v10 = vadd.f32 1.0, %v2205_v8 }
 0x422   : > { %2206 = vrcp.f32 %v673_v9 }
 0x423   : > { %2208 = vrcp.f32 %v674_v10 }
 0x424   : > { %2210 = vpow2.f32 %v1728_v35 }
 0x42c   : > { %v2207_v20 = vpop.eup %2206 }
 0x42d   : > { %v2209_v11 = vpop.eup %2208  ;;  %v679_v21 = vmul.f32 %v2207_v20, %v665_v63 }
 0x42e   : > { %v680_v13 = vmul.f32 %v2209_v11, %v666_v4  ;;  %v2211_v36 = vpop.eup %2210 }
 0x42f   : > { %v684_v14 = vrot.slane %v679_v21, 7  ;;  %818 = vmatprep.mubr.f32.mxu1 %v679_v21  ;;  %v908_v37 = vadd.f32 1.0, %v2211_v36  ;;  %v1376_v36 = vld [vmem:[#allocation7 + $0x10] sm:$0xff] }
 0x430   : > { %v685_v17 = vrot.slane %v680_v13, 7 }
 0x431   : > { %1727 = vmatmul.mubr.msk.f32.vlgmr.msra.gmra.mrb[4].mxu1 %vm2743_vm4, %v684_v14  ;;  %v690_v18 = vsel %vm683_vm3, 0.0, %v684_v14  ;;  %2212 = vrcp.f32 %v908_v37  ;;  %v1377_v37 = vld [vmem:[#allocation7 + $0x18] sm:$0xff] }
 0x432   : > { %v691_v19 = vsel %vm683_vm3, %v685_v17, 0.0  ;;  %823 = vmatprep.mubr.f32.mxu1 %v680_v13  ;;  %v686_v22 = vsel %vm683_vm3, %v684_v14, %v685_v17  ;;  %v695_v23 = vrot.slane %v690_v18, 2  ;;  %1929 = vmatpush3.xpose.msra.mxu1 %v2691_v1 }
 0x433   : > { %v696_v24 = vrot.slane %v686_v22, 2  ;;  %v698_v25 = vrot.slane %v691_v19, 2  ;;  %1938 = vmatprep.subr.mxu1 %v2422_v0 }
 0x435   : > { %824 = vmatmul.mubr.f32.gmra.mrb[6].mxu1 %v686_v22  ;;  %v697_v26 = vsel %vm694_vm5, %v695_v23, %v696_v24  ;;  %v699_v27 = vsel %vm694_vm5, %v696_v24, %v698_v25 }
 0x436   : > { %1925 = vmatprep.mubr.f32.mxu0 %v697_v26  ;;  %1930 = vmatprep.mubr.msk.f32.mxu1 %vm2423_vm0, %v2422_v0 }
 0x437   : > { %1926 = vmatmul.mubr.f32.vlgmr.msra.gmra.mrb[4].mxu0 %v699_v27  ;;  %v1390_v27 = vld [vmem:[#allocation7 + $0x80] sm:$0xff] }
 0x438   : > { %984 = vmatprep.mubr.f32.mxu0 %v2422_v0  ;;  %2050 = vmatpush1.bf16.msra.mxu0 %v2049_v33  ;;  %v2051_v30 = vpack.c.bf16 %v1391_v28, %v1390_v27  ;;  %v1393_v33 = vld [vmem:[#allocation7 + $0x98] sm:$0xff]  ;;  %v1386_v28 = vld [vmem:[#allocation7 + $0x60] sm:$0xff] }
 0x439   : > { %1933 = vmatprep.subr.mxu0 %v2422_v0  ;;  %v2055_v35 = vpack.c.bf16 %v1393_v33, %v1392_v32  ;;  %v1418_v32 = vld [vmem:[#allocation7 + $0x160] sm:$0xff]  ;;  %v1419_v33 = vld [vmem:[#allocation7 + $0x168] sm:$0xff] }
 0x43b   : > { %v2213_v38 = vpop.eup %2212 }
 0x43c   : > { %v911_v39 = vmul.f32 %v2213_v38, %v904_v34  ;;  %v2053_v34 = vpack.c.bf16 %v1375_v31, %v1374_v29  ;;  %v1406_v38 = vld [vmem:[#allocation7 + $0x100] sm:$0xff]  ;;  %v1387_v31 = vld [vmem:[#allocation7 + $0x68] sm:$0xff] }
 0x43e   : > { %1729 = vmatmul.mubr.msk.f32.vlgmr.msra.gmra.mrb[6].mxu0 %vm916_vm6, %v911_v39  ;;  %v1407_v39 = vld [vmem:[#allocation7 + $0x108] sm:$0xff] }
 0x43f   : > { %1934 = vmatpush3.msk.msra.mxu0 %vm414_vm1, %v2691_v1  ;;  %1935 = vmatprep.mubr.msk.f32.mxu0 %vm2423_vm0, %v2422_v0 }
 0x440   : > { %1943 = vmatprep.subr.mxu0 %v2422_v0 }
 0x504   : > { %v1785_v41 = vpop.f32.mrb[4].mxu1 }
 0x505   : > { %v1786_v43 = vpop.f32.mrb[5].mxu1 }
 0x506   : > { %v1787_v44 = vadd.f32 %v1786_v43, %v1785_v41  ;;  %v1395_v41 = vld [vmem:[#allocation7 + $0xa8] sm:$0xff]  ;;  %v2083_v43 = vpack.c.bf16 %v1407_v39, %v1406_v38  ;;  %v1388_v39 = vld [vmem:[#allocation7 + $0x70] sm:$0xff] }
 0x508   : > { %v1788_v45 = vpop.f32.mrb[6].mxu1  ;;  %v821_v46 = vadd.f32 %v1787_v44, %v753_v42  ;;  %v1408_v44 = vld [vmem:[#allocation7 + $0x110] sm:$0xff] }
 0x509   : > { %v1789_v47 = vpop.f32.mrb[7].mxu1 }
 0x50a   : > { %v1790_v48 = vadd.f32 %v1789_v47, %v1788_v45  ;;  %v1927_v49 = vpop.f32.mrb[4].mxu0  ;;  %v2059_v45 = vpack.c.bf16 %v1395_v41, %v1394_v40  ;;  %v1379_v47 = vld [vmem:[#allocation7 + $0x28] sm:$0xff]  ;;  %v1389_v40 = vld [vmem:[#allocation7 + $0x78] sm:$0xff] }
 0x50b   : > { %v895_v50 = vpop.f32.mrb[5].mxu0  ;;  %v2081_v41 = vpack.c.bf16 %v1389_v40, %v1388_v39 }
 0x50c   : > { %v826_v51 = vadd.f32 %v1790_v48, %v753_v42  ;;  %v896_v53 = vadd.f32 %v895_v50, %v821_v46  ;;  %v2057_v42 = vpack.c.bf16 %v1377_v37, %v1376_v36  ;;  %v1378_v46 = vld [vmem:[#allocation7 + $0x20] sm:$0xff]  ;;  %v1409_v48 = vld [vmem:[#allocation7 + $0x118] sm:$0xff]  ;;  %v1396_v50 = vld [vmem:[#allocation7 + $0xb0] sm:$0xff]  ;;  %v2077_v36 = vpack.c.bf16 %v1387_v31, %v1386_v28 }
 0x50d   : > { %v2107_v37 = vpack.c.bf16 %v1419_v33, %v1418_v32  ;;  %v1425_v31 = vrot.slane %v2733_v52, %v1424_v12 }
 0x50e   : > { %v901_v54 = vadd.f32 %v1927_v49, %v826_v51  ;;  %v2087_v49 = vpack.c.bf16 %v1409_v48, %v1408_v44  ;;  %v1397_v51 = vld [vmem:[#allocation7 + $0xb8] sm:$0xff]  ;;  %v1324_v48 = vsub.s32 4, %v2712_v15 }
 0x510   : > { %v998_v55 = vadd.f32 %v901_v54, %v896_v53 }
 0x511   : > { %v2775_v62 = vpop.f32.mrb[6].mxu0 }
 0x512   : > { %v999_v56 = vrot.slane %v998_v55, 4  ;;  %v2777_v63 = vpop.f32.mrb[7].mxu0 }
 0x514   : > { %v1000_v57 = vadd.f32 %v999_v56, %v998_v55  ;;  %v2061_v55 = vpack.c.bf16 %v1379_v47, %v1378_v46  ;;  %v1380_v56 = vld [vmem:[#allocation7 + $0x30] sm:$0xff]  ;;  %v1318_v46 = vsub.s32 3, %v2712_v15 }
 0x516   : > { %v1001_v58 = vrot.slane %v1000_v57, 2 }
 0x518   : > { %v1002_v59 = vadd.f32 %v1001_v58, %v1000_v57  ;;  %v2063_v58 = vpack.c.bf16 %v1397_v51, %v1396_v50  ;;  %v995_v50 = vrot.slane %v2733_v52, 7 }
 0x51a   : > { %v1003_v60 = vrot.slane %v1002_v59, 1 }
 0x51c   : > { %v1004_v61 = vadd.f32 %v1003_v60, %v1002_v59  ;;  %v1381_v59 = vld [vmem:[#allocation7 + $0x38] sm:$0xff]  ;;  %v1412_v60 = vld [vmem:[#allocation7 + $0x130] sm:$0xff] }
 0x51e   : > { %1931 = vmatmul.mubr.f32.vlgmr.msra.gmra.mrb[8].mxu1 %v1004_v61  ;;  %v1413_v61 = vld [vmem:[#allocation7 + $0x138] sm:$0xff] }
 0x51f   : > { %1939 = vmatpush3.xpose.msra.mxu1 %v2691_v1  ;;  %1940 = vmatprep.mubr.msk.f32.mxu1 %vm2423_vm0, %v2422_v0 }
 0x520   : > { %2052 = vmatprep.subr.bf16.mxu1 %v2051_v30 }
 0x5f1   : > { %v1071_v4 = vpop.f32.mrb[8].mxu1 }
 0x5f2   : > { %v1075_v5 = vmul.f32 0.001953125, %v1071_v4  ;;  %v1932_v6 = vpop.f32.mrb[9].mxu1  ;;  %v1398_v4 = vld [vmem:[#allocation7 + $0xc0] sm:$0xff] }
 0x5f3   : > { %v2065_v6 = vpack.c.bf16 %v1381_v59, %v1380_v56  ;;  %v997_v59 = vadd.f32 %v995_v50, %v2777_v63 }
 0x5f4   : > { %1936 = vmatmul.mubr.msk.f32.vlgmr.msra.gmra.mrb[8].mxu0 %vm410_vm2, %v1075_v5  ;;  %v1399_v5 = vld [vmem:[#allocation7 + $0xc8] sm:$0xff] }
 0x5f5   : > { %1944 = vmatpush3.msk.msra.mxu0 %vm414_vm1, %v2691_v1  ;;  %1945 = vmatprep.mubr.msk.f32.mxu0 %vm2423_vm0, %v2422_v0 }
 0x5f6   : > { %2084 = vmatprep.subr.bf16.mxu0 %v2083_v43 }
 0x6c7   : > { %v1145_v7 = vpop.f32.mrb[8].mxu0 }
 0x6c8   : > { %v1152_v8 = vrot.slane %v1145_v7, %v2715_v16  ;;  %v1937_v9 = vpop.f32.mrb[9].mxu0  ;;  %v1382_v7 = vld [vmem:[#allocation7 + $0x40] sm:$0xff] }
 0x6c9   : > { %v2067_v9 = vpack.c.bf16 %v1399_v5, %v1398_v4 }
 0x6ca   : > { %v2785_v10 = vsub.f32 %v896_v53, %v1152_v8  ;;  %v2787_v20 = vsub.f32 %v901_v54, %v1152_v8  ;;  %v1410_v53 = vld [vmem:[#allocation7 + $0x120] sm:$0xff]  ;;  %v1411_v54 = vld [vmem:[#allocation7 + $0x128] sm:$0xff]  ;;  %v2095_v8 = vpack.c.bf16 %v1413_v61, %v1412_v60 }
 0x6cb   : > { %v2091_v57 = vpack.c.bf16 %v1411_v54, %v1410_v53  ;;  %v1319_v53 = vrot.slane %v2733_v52, %v1318_v46 }
 0x6cc   : > { %v1155_v11 = vmul.f32 %v2785_v10, %v2785_v10  ;;  %v1156_v21 = vmul.f32 %v2787_v20, %v2787_v20 }
 0x6ce   : > { %v1157_v13 = vadd.f32 %v1156_v21, %v1155_v11  ;;  %v1383_v11 = vld [vmem:[#allocation7 + $0x48] sm:$0xff]  ;;  %v1414_v21 = vld [vmem:[#allocation7 + $0x140] sm:$0xff] }
 0x6d0   : > { %v1158_v14 = vrot.slane %v1157_v13, 4 }
 0x6d2   : > { %v1159_v1 = vadd.f32 %v1158_v14, %v1157_v13  ;;  %v1415_v13 = vld [vmem:[#allocation7 + $0x148] sm:$0xff]  ;;  %v1400_v14 = vld [vmem:[#allocation7 + $0xd0] sm:$0xff] }
 0x6d4   : > { %v1160_v17 = vrot.slane %v1159_v1, 2 }
 0x6d6   : > { %v1161_v18 = vadd.f32 %v1160_v17, %v1159_v1  ;;  %v1401_v1 = vld [vmem:[#allocation7 + $0xd8] sm:$0xff]  ;;  %v2069_v17 = vpack.c.bf16 %v1383_v11, %v1382_v7 }
 0x6d8   : > { %v1162_v0 = vrot.slane %v1161_v18, 1 }
 0x6da   : > { %v1163_v19 = vadd.f32 %v1162_v0, %v1161_v18  ;;  %v1384_v18 = vld [vmem:[#allocation7 + $0x50] sm:$0xff]  ;;  %v2099_v0 = vpack.c.bf16 %v1415_v13, %v1414_v21 }
 0x6dc   : > { %1941 = vmatmul.mubr.f32.vlgmr.msra.gmra.mrb[10].mxu1 %v1163_v19  ;;  %v2071_v19 = vpack.c.bf16 %v1401_v1, %v1400_v14 }
 0x6dd   : > { %2054 = vmatpush3.bf16.msra.mxu1 %v2053_v34  ;;  %v1404_v34 = vld [vmem:[#allocation7 + $0xf0] sm:$0xff] }
 0x6de   : > { %2056 = vmatprep.subr.bf16.mxu1 %v2055_v35  ;;  %v1405_v35 = vld [vmem:[#allocation7 + $0xf8] sm:$0xff] }
 0x6df   : > { %v2079_v38 = vpack.c.bf16 %v1405_v35, %v1404_v34 }
 0x6e1   : > { %2058 = vmatpush3.bf16.msra.mxu1 %v2057_v42  ;;  %v1420_v42 = vld [vmem:[#allocation7 + $0x170] sm:$0xff] }
 0x6e2   : > { %2060 = vmatprep.subr.bf16.mxu1 %v2059_v45  ;;  %v992_v45 = vrot.slane %v2733_v52, 6 }
 0x6e4   : > { %v994_v47 = vadd.f32 %v992_v45, %v2775_v62 }
 0x6e5   : > { %2062 = vmatpush3.bf16.msra.mxu1 %v2061_v55 }
 0x6e6   : > { %2064 = vmatprep.subr.bf16.mxu1 %v2063_v58  ;;  %v1328_v55 = vadd.f32 1.0, %v994_v47  ;;  %v1325_v58 = vrot.slane %v2733_v52, %v1324_v48 }
 0x6e8   : > { %v1332_v61 = vrot.slane %v1328_v55, %v2715_v16 }
 0x6e9   : > { %2066 = vmatpush3.bf16.msra.mxu1 %v2065_v6  ;;  %v1338_v6 = vrot.slane %v997_v59, %v2715_v16 }
 0x6ea   : > { %2068 = vmatprep.subr.bf16.mxu1 %v2067_v9 }
 0x6ed   : > { %2070 = vmatpush3.bf16.msra.mxu1 %v2069_v17 }
 0x6ee   : > { %2072 = vmatprep.subr.bf16.mxu1 %v2071_v19 }
 0x7af   : > { %v1230_v22 = vpop.f32.mrb[10].mxu1 }
 0x7b0   : > { %v1234_v23 = vmul.f32 0.001953125, %v1230_v22  ;;  %v1942_v24 = vpop.f32.mrb[11].mxu1  ;;  %v1385_v22 = vld [vmem:[#allocation7 + $0x58] sm:$0xff] }
 0x7b1   : > { %v1417_v24 = vld [vmem:[#allocation7 + $0x158] sm:$0xff]  ;;  %v2073_v27 = vpack.c.bf16 %v1385_v22, %v1384_v18 }
 0x7b2   : > { %v1235_v25 = vadd.f32 1e-05, %v1234_v23  ;;  %v1416_v23 = vld [vmem:[#allocation7 + $0x150] sm:$0xff] }
 0x7b3   : > { %v2103_v29 = vpack.c.bf16 %v1417_v24, %v1416_v23  ;;  %2074 = vmatpush3.bf16.msra.mxu1 %v2073_v27 }
 0x7b4   : > { %2214 = vrsqrt.f32 %v1235_v25  ;;  %v1402_v25 = vld [vmem:[#allocation7 + $0xe0] sm:$0xff] }
 0x7be   : > { %v2215_v26 = vpop.eup %2214 }
 0x7bf   : > { %1946 = vmatmul.mubr.msk.f32.vlgmr.msra.gmra.mrb[10].mxu0 %vm410_vm2, %v2215_v26  ;;  %v1403_v26 = vld [vmem:[#allocation7 + $0xe8] sm:$0xff] }
 0x7c0   : > { %2086 = vmatpush3.bf16.msra.mxu0 %v2083_v43  ;;  %v2075_v30 = vpack.c.bf16 %v1403_v26, %v1402_v25  ;;  %v1421_v43 = vld [vmem:[#allocation7 + $0x178] sm:$0xff] }
 0x7c1   : > { %2088 = vmatprep.subr.bf16.mxu0 %v2087_v49  ;;  %v2111_v44 = vpack.c.bf16 %v1421_v43, %v1420_v42 }
 0x7c2   : > { %2076 = vmatprep.subr.bf16.mxu1 %v2075_v30 }
 0x7c3   : > { %2078 = vmatpush3.bf16.msra.mxu1 %v2077_v36 }
 0x7c4   : > { %2090 = vmatpush3.bf16.msra.mxu0 %v2087_v49  ;;  %2080 = vmatprep.subr.bf16.mxu1 %v2079_v38 }
 0x7c5   : > { %2092 = vmatprep.subr.bf16.mxu0 %v2091_v57 }
 0x7c7   : > { %2082 = vmatpush3.bf16.msra.mxu1 %v2081_v41 }
 0x7c8   : > { %2094 = vmatpush3.bf16.msra.mxu0 %v2091_v57 }
 0x7c9   : > { %2096 = vmatprep.subr.bf16.mxu0 %v2095_v8 }
 0x7cc   : > { %2098 = vmatpush3.bf16.msra.mxu0 %v2095_v8 }
 0x7cd   : > { %2100 = vmatprep.subr.bf16.mxu0 %v2099_v0 }
 0x7d0   : > { %2102 = vmatpush3.bf16.msra.mxu0 %v2099_v0 }
 0x7d1   : > { %2104 = vmatprep.subr.bf16.mxu0 %v2103_v29 }
 0x7d4   : > { %2106 = vmatpush3.bf16.msra.mxu0 %v2103_v29 }
 0x7d5   : > { %2108 = vmatprep.subr.bf16.mxu0 %v2107_v37 }
 0x7d8   : > { %2110 = vmatpush3.bf16.msra.mxu0 %v2107_v37 }
 0x7d9   : > { %2112 = vmatprep.subr.bf16.mxu0 %v2111_v44 }
 0x7dc   : > { %2114 = vmatpush3.bf16.msra.mxu0 %v2111_v44 }
 0x892   : > { %v1306_v49 = vpop.f32.mrb[10].mxu0 }
 0x893   : > { %v1313_v51 = vrot.slane %v1306_v49, %v2715_v16  ;;  %v1947_v54 = vpop.f32.mrb[11].mxu0 }
 0x895   : > { %v1314_v56 = vmul.f32 %v1313_v51, %v2785_v10  ;;  %v1315_v57 = vmul.f32 %v1313_v51, %v2787_v20 }
 0x897   : > { %v1320_v62 = vmul.f32 %v1319_v53, %v1314_v56  ;;  %v1321_v60 = vmul.f32 %v1319_v53, %v1315_v57 }
 0x899   : > { %v1326_v4 = vadd.f32 %v1325_v58, %v1320_v62  ;;  %v1327_v5 = vadd.f32 %v1325_v58, %v1321_v60 }
 0x89b   : > { %v1333_v7 = vmul.f32 %v1332_v61, %v1326_v4  ;;  %v1334_v8 = vmul.f32 %v1332_v61, %v1327_v5 }
 0x89d   : > { %v1339_v9 = vadd.f32 %v1338_v6, %v1333_v7  ;;  %v1340_v11 = vadd.f32 %v1338_v6, %v1334_v8 }
 0x89f   : > { %v1734_v21 = vmul.f32 -1.442695, %v1339_v9  ;;  %v1735_v10 = vmul.f32 -1.442695, %v1340_v11 }
 0x8a1   : > { %2216 = vpow2.f32 %v1734_v21 }
 0x8a2   : > { %2218 = vpow2.f32 %v1735_v10 }
 0x8ab   : > { %v2217_v20 = vpop.eup %2216 }
 0x8ac   : > { %v2219_v13 = vpop.eup %2218  ;;  %v1347_v14 = vadd.f32 1.0, %v2217_v20 }
 0x8ad   : > { %v1348_v63 = vadd.f32 1.0, %v2219_v13 }
 0x8ae   : > { %2220 = vrcp.f32 %v1347_v14 }
 0x8af   : > { %2222 = vrcp.f32 %v1348_v63 }
 0x8b8   : > { %v2221_v1 = vpop.eup %2220 }
 0x8b9   : > { %v2223_v17 = vpop.eup %2222  ;;  %v1353_v18 = vmul.f32 %v2221_v1, %v1339_v9 }
 0x8ba   : > { %v1354_v0 = vmul.f32 %v2223_v17, %v1340_v11 }
 0x8bb   : > { %v1357_v19 = vrot.slane %v1353_v18, 7  ;;  %1490 = vmatprep.mubr.f32.mxu1 %v1353_v18 }
 0x8bc   : > { %v1358_v16 = vrot.slane %v1354_v0, 7 }
 0x8bd   : > { %1737 = vmatmul.mubr.msk.f32.vlgmr.msra.gmra.mrb[12].mxu1 %vm2743_vm4, %v1357_v19  ;;  %v1363_v22 = vsel %vm683_vm3, 0.0, %v1357_v19 }
 0x8be   : > { %v1364_v23 = vsel %vm683_vm3, %v1358_v16, 0.0  ;;  %1495 = vmatprep.mubr.f32.mxu1 %v1354_v0  ;;  %v1359_v24 = vsel %vm683_vm3, %v1357_v19, %v1358_v16  ;;  %v1367_v25 = vrot.slane %v1363_v22, 2 }
 0x8bf   : > { %v1368_v26 = vrot.slane %v1359_v24, 2  ;;  %v1370_v27 = vrot.slane %v1364_v23, 2 }
 0x8c1   : > { %1496 = vmatmul.mubr.f32.gmra.mrb[14].mxu1 %v1359_v24  ;;  %v1369_v28 = vsel %vm694_vm5, %v1367_v25, %v1368_v26  ;;  %v1371_v29 = vsel %vm694_vm5, %v1368_v26, %v1370_v27 }
 0x8c2   : > { %1980 = vmatprep.mubr.f32.mxu0 %v1369_v28 }
 0x8c3   : > { %1981 = vmatmul.mubr.f32.vlgmr.msra.gmra.mrb[12].mxu0 %v1371_v29 }
 0x990   : > { %v1849_v30 = vpop.f32.mrb[12].mxu1 }
 0x991   : > { %v1850_v32 = vpop.f32.mrb[13].mxu1 }
 0x992   : > { %v1851_v33 = vadd.f32 %v1850_v32, %v1849_v30 }
 0x994   : > { %v1852_v34 = vpop.f32.mrb[14].mxu1  ;;  %v1493_v35 = vadd.f32 %v1851_v33, %v1425_v31 }
 0x995   : > { %v1853_v36 = vpop.f32.mrb[15].mxu1 }
 0x996   : > { %v1854_v37 = vadd.f32 %v1853_v36, %v1852_v34  ;;  %v1982_v38 = vpop.f32.mrb[12].mxu0 }
 0x997   : > { %v1567_v39 = vpop.f32.mrb[13].mxu0 }
 0x998   : > { %v1498_v40 = vadd.f32 %v1854_v37, %v1425_v31  ;;  %v1568_v41 = vadd.f32 %v1567_v39, %v1493_v35 }
 0x99a   : > { %v1573_v15 = vadd.f32 %v1982_v38, %v1498_v40  ;;  %v1576_v42 = vadd.f32 %v1568_v41, %v2693_v2 }
 0x99c   : > { %v1577_v52 = vadd.f32 %v1573_v15, %v2695_v3  ;;  %1578 = vst [vmem:[%s324_s20] sm:$0xff] %v1576_v42 }
 0x99e   : > { %1579 = vst [vmem:[%s324_s20 + $0x8] sm:$0xff] %v1577_v52 }
 0x99f   : > { %2351 = shalt.err (!%p2348_p9)
}
 0x9a0   : > { %s2352_s10 = scalar_lea.hbm %s2825_s27, 256  ;;  %s2356_s8 = scalar_lea.hbm %s2876_s6, 512 }
 0x9a1   : > { %p2353_p0 = scmp.ne.s32.totalorder %s2825_s27, %s2352_s10  ;;  %p2357_p13 = scmp.lt.u32.totalorder %s2825_s27, %s2876_s6 }
 0x9a2   : > { %p2358_p6 = scmp.lt.u32.totalorder %s2356_s8, %s2352_s10  ;;  %p2360_p3 = scmp.lt.u32.totalorder %s2352_s10, %s2825_s27 }
 0x9a3   : > { %p2354_p11 = pnand %p2353_p0, %p2613_p5 }
 0x9a4   : > { %p2359_p10 = por %p2358_p6, %p2357_p13 }
 0x9a5   : > { %p2355_p8 = pneg %p2354_p11 }
 0x9a6   : > { %p2361_p7 = por %p2360_p3, %p2359_p10 }
 0x9a8   : > { %p2362_p12 = pnand %p2361_p7, %p2355_p8 }
 0x9aa   : > { %2365 = shalt.err (!%p2362_p12)
}
 0x9ab   : > { %s2425_s18 = smov 128   ;;  %s2426_s13 = smov 8  }
 0x9ac   : > { %2129 = dma.vmem_to_hbm [thread:$0]  (%p2613_p5), %s2820_s12, 256, %s2825_s27, %s1581_s26, %s2425_s18, %s2425_s18, %s2426_s13  }
 0x9ad PF: > { %s1609_s29 = sand.u32 1, %s2400_s21   ;;  %p2896_p1 = scmp.ne.s32.totalorder %s2881_s28, 0 }
 0x9ae   : > { %p2897_p2 = scmp.ge.s32.totalorder %s2412_s24, 2  ;;  %s1610_s25 = scalar_lea.sflag [#allocation4], %s1609_s29 }
 0x9b0   : > { %p2146_p4 = pnand %p2897_p2, %p2896_p1 }
 0x9b2   : > { %2395 = dma.done.wait (!%p2146_p4), %s1610_s25, 256  }
 0x9b3   : > { %2397 = vsyncadd (!%p2146_p4), %s1610_s25, 4294967040  ;;  %p21_p9 = scmp.ge.s32.totalorder %s2599_s14, 4   ;;  %s2898_s21 = smov %s2404_s22 }
 0x9b4   : > { %s2899_s22 = smov %s2408_s23  ;;  %s2900_s23 = smov %s2609_s17 }
 0x9b5   : > { %s2901_s24 = smov %s2599_s14  ;;  %23 = sbr.rel (!%p21_p9) target bundleno = 7 (0x7), region = 104 }
 0x9bc   :  { %1615 = vsyncpa [#allocation3], 1 }
 0x9bd   :  { %1617 = vsyncpa [#allocation3 + $0x1], 1 }
 0x9be   :  { %1618 = vsyncpa [#allocation6], 1 }
 0x9bf   :  { %1619 = vsyncpa [#allocation9], 1 }
 0x9c0   :  { %1620 = vsyncpa [#allocation4], 1 }
 0x9c1   :  { %1622 = vsyncpa [#allocation4 + $0x1], 1 }

</bundles_post_ra>
